<compile_context>
chip_gen: v5e
topology: v5e:2x2
jax: 0.10.0
libtpu: 0.0.40
codegen_flags: <defaults>
</compile_context>

<pallas_src>
import jax
import jax.numpy as jnp
from jax.experimental import pallas as pl
from jax.experimental.pallas import tpu as pltpu


# ----------------------------------------------------------------------------
# Packed-weight layout (rows 8-aligned so every static slice starts on a
# sublane-tile boundary; 128 cols = one full lane tile).  "x4" means the
# per-sample block replicated 4x block-diagonally for the batch-lane fold.
#   rows   0: 64  W1a x4 : img half of fused layer1, (64,124)  cols 0:124
#   rows  64: 76  W1b x4 : usr half of fused layer1, (12,124)  cols 0:124
#   rows  80:204  W2  x4 : blockdiag(wi2@wi3, wu2) x4, (124,52) cols 0:52
#   rows 208:260  Wc1 x4 : (52,32)   cols 0:32
#   rows 264:296  Wc2 x4 : (32,32)   cols 0:32
#   rows 296:328  Wc3 x4 : (32,16)   cols 0:16
#   row  328      bc1 x4 (1,32)   row 336  bc2 x4 (1,32)   row 344 bc3 x4 (1,16)
# ----------------------------------------------------------------------------
_PACK_ROWS = 352
_PACK_COLS = 128
_FOLD = 4          # batch rows folded into the lane axis


def mixed_kernel(img_ref, usr_ref, w_ref, out_ref):
    f32 = jnp.float32
    img = img_ref[...]                       # (tile_m, 64)  f32 or bf16
    usr = usr_ref[...]                       # (tile_m, 12)

    # fused layer 1: [img | usr] @ blockdiag4(blockdiag(wi1, wu1)) — split by
    # input so torch.cat is never materialized.  Cols 124:128 of the weight
    # slab are zero, so full 128-lane slices are safe (and load unmasked).
    h = jnp.dot(img, w_ref[0:64, 0:128], preferred_element_type=f32)
    h = h + jnp.dot(usr, w_ref[64:76, 0:128], preferred_element_type=f32)
    h = jnp.maximum(h, 0.0)                  # (tile_m, 128), cols>=124 are 0

    # TODO(synk): Dropout(p=0.25) applied as identity (eval semantics);
    #             PyTorch training-mode dropout mask/scale not reproduced.

    # fused layer 2: blockdiag4(blockdiag(wi2 @ wi3, wu2)).  Rows 204:208 of
    # the slab are zero, matching h's zero cols, so K=128 dense is exact.
    h = jnp.maximum(
        jnp.dot(h, w_ref[80:208, 0:52], preferred_element_type=f32), 0.0)

    # combined head: Linear(13,8)+b ReLU, Linear(8,8)+b ReLU, Linear(8,4)+b,
    # tanh — all 4x lane-replicated, biases tiled 4x along lanes.
    h = jnp.maximum(
        jnp.dot(h, w_ref[208:260, 0:32], preferred_element_type=f32)
        + w_ref[328:329, 0:32], 0.0)
    h = jnp.maximum(
        jnp.dot(h, w_ref[264:296, 0:32], preferred_element_type=f32)
        + w_ref[336:337, 0:32], 0.0)
    h = jnp.dot(h, w_ref[296:328, 0:16], preferred_element_type=f32) \
        + w_ref[344:345, 0:16]
    out_ref[...] = jnp.tanh(h).astype(out_ref.dtype)


# ----------------------------------------------------------------------------
# Parameter helpers
# ----------------------------------------------------------------------------
def init_params(key):
    """Deterministic synthetic parameters, stored as (in, out) matmul weights."""
    ks = jax.random.split(key, 11)

    def lin(k, fan_in, fan_out):
        bound = 1.0 / jnp.sqrt(jnp.float32(fan_in))
        return jax.random.uniform(k, (fan_in, fan_out), jnp.float32, -bound, bound)

    def bias(k, fan_in, fan_out):
        bound = 1.0 / jnp.sqrt(jnp.float32(fan_in))
        return jax.random.uniform(k, (1, fan_out), jnp.float32, -bound, bound)

    return {
        # img branch (bias=False): Linear(16,28) ReLU Linear(28,28) Linear(28,10) ReLU
        "wi1": lin(ks[0], 16, 28),
        "wi2": lin(ks[1], 28, 28),
        "wi3": lin(ks[2], 28, 10),
        # user branch (bias=False): Linear(3,3) ReLU Dropout Linear(3,3) ReLU
        "wu1": lin(ks[3], 3, 3),
        "wu2": lin(ks[4], 3, 3),
        # combined head (with bias)
        "wc1": lin(ks[5], 13, 8),
        "bc1": bias(ks[6], 13, 8),
        "wc2": lin(ks[7], 8, 8),
        "bc2": bias(ks[8], 8, 8),
        "wc3": lin(ks[9], 8, 4),
        "bc3": bias(ks[10], 8, 4),
    }


def _blkdiag4(w):
    """Replicate a per-sample weight 4x block-diagonally for the lane fold."""
    r, c = w.shape
    out = jnp.zeros((_FOLD * r, _FOLD * c), jnp.float32)
    for j in range(_FOLD):
        out = out.at[j * r:(j + 1) * r, j * c:(j + 1) * c].set(w)
    return out


def pack_params(params):
    """Fuse + 4x-replicate + pack all weights/biases into one (352,128) f32 array."""
    wi23 = params["wi2"] @ params["wi3"]                       # (28,10): no ReLU between

    # per-sample fused blocks
    w1a = jnp.zeros((16, 31), jnp.float32).at[:, 0:28].set(params["wi1"])
    w1b = jnp.zeros((3, 31), jnp.float32).at[:, 28:31].set(params["wu1"])
    w2 = jnp.zeros((31, 13), jnp.float32)
    w2 = w2.at[0:28, 0:10].set(wi23).at[28:31, 10:13].set(params["wu2"])

    P = jnp.zeros((_PACK_ROWS, _PACK_COLS), jnp.float32)
    P = P.at[0:64, 0:124].set(_blkdiag4(w1a))                  # img -> fused 124
    P = P.at[64:76, 0:124].set(_blkdiag4(w1b))                 # usr -> fused 124
    P = P.at[80:204, 0:52].set(_blkdiag4(w2))                  # 124 -> 52
    P = P.at[208:260, 0:32].set(_blkdiag4(params["wc1"]))      # 52 -> 32
    P = P.at[264:296, 0:32].set(_blkdiag4(params["wc2"]))      # 32 -> 32
    P = P.at[296:328, 0:16].set(_blkdiag4(params["wc3"]))      # 32 -> 16
    P = P.at[328:329, 0:32].set(jnp.tile(params["bc1"].reshape(1, 8), (1, _FOLD)))
    P = P.at[336:337, 0:32].set(jnp.tile(params["bc2"].reshape(1, 8), (1, _FOLD)))
    P = P.at[344:345, 0:16].set(jnp.tile(params["bc3"].reshape(1, 4), (1, _FOLD)))
    return P


def _cdiv(a, b):
    return (a + b - 1) // b


def _round_up(x, m):
    return (x + m - 1) // m * m


# ----------------------------------------------------------------------------
# Wrapper
# ----------------------------------------------------------------------------
def mixed_network_forward(img_features, user_features, params, *, max_tile_m=2048):
    """Full MixedNetwork forward pass in one batch-tiled Pallas kernel.

    Inputs may be f32 or bf16 (bf16 halves HBM traffic and feeds the MXU
    natively); accumulation and all elementwise math are f32.
    """
    B = img_features.shape[0]
    assert user_features.shape[0] == B
    assert img_features.shape[1] == 16 and user_features.shape[1] == 3

    wpack = pack_params(params)                     # (352, 128) f32, 176 KiB

    # ---- batch-lane fold + balanced tiling --------------------------------
    # Folded rows needed (4 batch rows per folded row).
    bf_needed = _cdiv(B, _FOLD)
    # Balanced tile count; cap tile size, and keep the grid even when there is
    # more than one minimal tile of work so v7x's 2 TensorCores split evenly.
    num_tiles = max(1, _cdiv(bf_needed, max_tile_m))
    if bf_needed > 8:
        num_tiles = _round_up(num_tiles, 2)
    tile_m = max(8, _round_up(_cdiv(bf_needed, num_tiles), 8))
    bf = num_tiles * tile_m                         # folded rows after padding
    b_pad = bf * _FOLD                              # original rows after padding

    if b_pad != B:
        img_features = jnp.pad(img_features, ((0, b_pad - B), (0, 0)))
        user_features = jnp.pad(user_features, ((0, b_pad - B), (0, 0)))

    # Free row-major views: 4 batch rows folded into the lane axis.
    img_f = img_features.reshape(bf, _FOLD * 16)    # (bf, 64)
    usr_f = user_features.reshape(bf, _FOLD * 12 // 4)  # (bf, 12)

    grid = (num_tiles,)

    # Actual MXU work issued per folded row (block-diagonal, K=128 layer 2).
    flops = 2 * bf * (64 * 124 + 12 * 124 + 124 * 52 + 52 * 32 + 32 * 32 + 32 * 16)
    bytes_accessed = (img_f.size * img_f.dtype.itemsize
                      + usr_f.size * usr_f.dtype.itemsize
                      + wpack.size * 4 + bf * 16 * 4)

    out = pl.pallas_call(
        mixed_kernel,
        out_shape=jax.ShapeDtypeStruct((bf, _FOLD * 4), jnp.float32),
        grid=grid,
        in_specs=[
            pl.BlockSpec((tile_m, 64), lambda i: (i, 0)),
            pl.BlockSpec((tile_m, 12), lambda i: (i, 0)),
            # constant block index -> weights DMA'd once, resident across tiles
            pl.BlockSpec((_PACK_ROWS, _PACK_COLS), lambda i: (0, 0)),
        ],
        out_specs=pl.BlockSpec((tile_m, _FOLD * 4), lambda i: (i, 0)),
        compiler_params=pltpu.CompilerParams(
            dimension_semantics=("parallel",)),     # shard batch over v7x's 2 TCs
        cost_estimate=pl.CostEstimate(
            flops=flops, transcendentals=16 * bf, bytes_accessed=bytes_accessed),
    )(img_f, usr_f, wpack)

    # Un-fold the lane axis (free view) and drop padded rows.
    return out.reshape(b_pad, 4)[:B]


# ----------------------------------------------------------------------------
# Pure-JAX reference (same math as the PyTorch module, dropout = identity)
# ----------------------------------------------------------------------------
def reference_forward(img_features, user_features, params):
    img = img_features.astype(jnp.float32)
    usr = user_features.astype(jnp.float32)
    a = jnp.maximum(img @ params["wi1"], 0.0)
    a = a @ params["wi2"]
    a = jnp.maximum(a @ params["wi3"], 0.0)
    b = jnp.maximum(usr @ params["wu1"], 0.0)
    b = jnp.maximum(b @ params["wu2"], 0.0)
    x = jnp.concatenate([a, b], axis=1)
    x = jnp.maximum(x @ params["wc1"] + params["bc1"], 0.0)
    x = jnp.maximum(x @ params["wc2"] + params["bc2"], 0.0)
    x = x @ params["wc3"] + params["bc3"]
    return jnp.tanh(x)


if __name__ == "__main__":
    key = jax.random.PRNGKey(0)
    k_params, k_img, k_usr = jax.random.split(key, 3)
    params = init_params(k_params)

    # Small demo shapes consistent with the module: (B, 16) image embedding,
    # (B, 3) user features.
    B = 8
    img_features = jax.random.normal(k_img, (B, 16), jnp.float32)
    user_features = jax.random.normal(k_usr, (B, 3), jnp.float32)

    out = mixed_network_forward(img_features, user_features, params)
    out = jax.block_until_ready(out)
    ref = reference_forward(img_features, user_features, params)
    assert out.shape == (B, 4)
    assert jnp.allclose(out, ref, atol=2e-5, rtol=2e-5), "mismatch vs reference (B=8)"

    # Exercise the multi-tile grid + fold/padding path (non-multiple batch).
    B2 = 5000
    k_img2, k_usr2 = jax.random.split(jax.random.PRNGKey(1), 2)
    img2 = jax.random.normal(k_img2, (B2, 16), jnp.float32)
    usr2 = jax.random.normal(k_usr2, (B2, 3), jnp.float32)
    out2 = jax.block_until_ready(mixed_network_forward(img2, usr2, params))
    ref2 = reference_forward(img2, usr2, params)
    assert out2.shape == (B2, 4)
    assert jnp.allclose(out2, ref2, atol=2e-5, rtol=2e-5), "mismatch vs reference (B=5000)"

    print("KERNEL_OK")
</pallas_src>

<mosaic_0001>
module attributes {stable_mosaic.version = 11 : i64} {
  func.func @mixed_kernel(%arg0: i32, %arg1: memref<8x64xf32, #tpu.memory_space<vmem>>, %arg2: memref<8x12xf32, #tpu.memory_space<vmem>>, %arg3: memref<352x128xf32, #tpu.memory_space<vmem>>, %arg4: memref<8x16xf32, #tpu.memory_space<vmem>>) attributes {dimension_semantics = [#tpu.dimension_semantics<parallel>], iteration_bounds = array<i64: 1>, scalar_prefetch = 0 : i64, scratch_operands = 0 : i64, tpu.core_type = #tpu.core_type<tc>, window_params = [{transform_indices = @transform_0, window_bounds = array<i64: 8, 64>}, {transform_indices = @transform_1, window_bounds = array<i64: 8, 12>}, {pipeline_mode = #tpu.pipeline_mode<synchronous>, transform_indices = @transform_2, window_bounds = array<i64: 352, 128>}, {transform_indices = @transform_3, window_bounds = array<i64: 8, 16>}]} {
    %c0 = arith.constant 0 : index
    %c0_0 = arith.constant 0 : index
    %0 = vector.load %arg1[%c0, %c0_0] : memref<8x64xf32, #tpu.memory_space<vmem>>, vector<8x64xf32>
    %c0_1 = arith.constant 0 : index
    %c0_2 = arith.constant 0 : index
    %1 = vector.load %arg2[%c0_1, %c0_2] : memref<8x12xf32, #tpu.memory_space<vmem>>, vector<8x12xf32>
    %c0_3 = arith.constant 0 : index
    %c0_4 = arith.constant 0 : index
    %2 = vector.load %arg3[%c0_3, %c0_4] : memref<352x128xf32, #tpu.memory_space<vmem>>, vector<64x128xf32>
    %cst = arith.constant dense<0.000000e+00> : vector<8x128xf32>
    %3 = tpu.matmul %0, %2, %cst {dimension_numbers = #tpu.dot_dimension_numbers<[1], [0], [0], [1], [0, 0, 1, 1], [], []>} : vector<8x64xf32>, vector<64x128xf32>, vector<8x128xf32> -> vector<8x128xf32>
    %c64 = arith.constant 64 : index
    %c0_5 = arith.constant 0 : index
    %4 = vector.load %arg3[%c64, %c0_5] : memref<352x128xf32, #tpu.memory_space<vmem>>, vector<12x128xf32>
    %cst_6 = arith.constant dense<0.000000e+00> : vector<8x128xf32>
    %5 = tpu.matmul %1, %4, %cst_6 {dimension_numbers = #tpu.dot_dimension_numbers<[1], [0], [0], [1], [0, 0, 1, 1], [], []>} : vector<8x12xf32>, vector<12x128xf32>, vector<8x128xf32> -> vector<8x128xf32>
    %6 = arith.addf %3, %5 : vector<8x128xf32>
    %cst_7 = arith.constant 0.000000e+00 : f32
    %7 = vector.broadcast %cst_7 : f32 to vector<8x128xf32>
    %8 = arith.maximumf %6, %7 : vector<8x128xf32>
    %c80 = arith.constant 80 : index
    %c0_8 = arith.constant 0 : index
    %9 = vector.load %arg3[%c80, %c0_8] : memref<352x128xf32, #tpu.memory_space<vmem>>, vector<128x52xf32>
    %cst_9 = arith.constant dense<0.000000e+00> : vector<8x52xf32>
    %10 = tpu.matmul %8, %9, %cst_9 {dimension_numbers = #tpu.dot_dimension_numbers<[1], [0], [0], [1], [0, 0, 1, 1], [], []>} : vector<8x128xf32>, vector<128x52xf32>, vector<8x52xf32> -> vector<8x52xf32>
    %cst_10 = arith.constant 0.000000e+00 : f32
    %11 = vector.broadcast %cst_10 : f32 to vector<8x52xf32>
    %12 = arith.maximumf %10, %11 : vector<8x52xf32>
    %c208 = arith.constant 208 : index
    %c0_11 = arith.constant 0 : index
    %13 = vector.load %arg3[%c208, %c0_11] : memref<352x128xf32, #tpu.memory_space<vmem>>, vector<52x32xf32>
    %cst_12 = arith.constant dense<0.000000e+00> : vector<8x32xf32>
    %14 = tpu.matmul %12, %13, %cst_12 {dimension_numbers = #tpu.dot_dimension_numbers<[1], [0], [0], [1], [0, 0, 1, 1], [], []>} : vector<8x52xf32>, vector<52x32xf32>, vector<8x32xf32> -> vector<8x32xf32>
    %c328 = arith.constant 328 : index
    %c0_13 = arith.constant 0 : index
    %15 = vector.load %arg3[%c328, %c0_13] : memref<352x128xf32, #tpu.memory_space<vmem>>, vector<1x32xf32>
    %16 = vector.broadcast %15 : vector<1x32xf32> to vector<8x32xf32>
    %17 = arith.addf %14, %16 : vector<8x32xf32>
    %cst_14 = arith.constant 0.000000e+00 : f32
    %18 = vector.broadcast %cst_14 : f32 to vector<8x32xf32>
    %19 = arith.maximumf %17, %18 : vector<8x32xf32>
    %c264 = arith.constant 264 : index
    %c0_15 = arith.constant 0 : index
    %20 = vector.load %arg3[%c264, %c0_15] : memref<352x128xf32, #tpu.memory_space<vmem>>, vector<32x32xf32>
    %cst_16 = arith.constant dense<0.000000e+00> : vector<8x32xf32>
    %21 = tpu.matmul %19, %20, %cst_16 {dimension_numbers = #tpu.dot_dimension_numbers<[1], [0], [0], [1], [0, 0, 1, 1], [], []>} : vector<8x32xf32>, vector<32x32xf32>, vector<8x32xf32> -> vector<8x32xf32>
    %c336 = arith.constant 336 : index
    %c0_17 = arith.constant 0 : index
    %22 = vector.load %arg3[%c336, %c0_17] : memref<352x128xf32, #tpu.memory_space<vmem>>, vector<1x32xf32>
    %23 = vector.broadcast %22 : vector<1x32xf32> to vector<8x32xf32>
    %24 = arith.addf %21, %23 : vector<8x32xf32>
    %cst_18 = arith.constant 0.000000e+00 : f32
    %25 = vector.broadcast %cst_18 : f32 to vector<8x32xf32>
    %26 = arith.maximumf %24, %25 : vector<8x32xf32>
    %c296 = arith.constant 296 : index
    %c0_19 = arith.constant 0 : index
    %27 = vector.load %arg3[%c296, %c0_19] : memref<352x128xf32, #tpu.memory_space<vmem>>, vector<32x16xf32>
    %cst_20 = arith.constant dense<0.000000e+00> : vector<8x16xf32>
    %28 = tpu.matmul %26, %27, %cst_20 {dimension_numbers = #tpu.dot_dimension_numbers<[1], [0], [0], [1], [0, 0, 1, 1], [], []>} : vector<8x32xf32>, vector<32x16xf32>, vector<8x16xf32> -> vector<8x16xf32>
    %c344 = arith.constant 344 : index
    %c0_21 = arith.constant 0 : index
    %29 = vector.load %arg3[%c344, %c0_21] : memref<352x128xf32, #tpu.memory_space<vmem>>, vector<1x16xf32>
    %30 = vector.broadcast %29 : vector<1x16xf32> to vector<8x16xf32>
    %31 = arith.addf %28, %30 : vector<8x16xf32>
    %32 = math.tanh %31 : vector<8x16xf32>
    %c0_22 = arith.constant 0 : index
    %c0_23 = arith.constant 0 : index
    %33 = vector.load %arg4[%c0_22, %c0_23] : memref<8x16xf32, #tpu.memory_space<vmem>>, vector<8x16xf32>
    tpu.vector_store %arg4[%c0_22, %c0_23], %32 {strides = array<i32>} : memref<8x16xf32, #tpu.memory_space<vmem>>, vector<8x16xf32>,
    return
  }
  func.func @transform_0(%arg0: i32) -> (i32, i32) {
    %c0_i32 = arith.constant 0 : i32
    %c0_i32_0 = arith.constant 0 : i32
    return %arg0, %c0_i32 : i32, i32
  }
  func.func @transform_1(%arg0: i32) -> (i32, i32) {
    %c0_i32 = arith.constant 0 : i32
    %c0_i32_0 = arith.constant 0 : i32
    return %arg0, %c0_i32 : i32, i32
  }
  func.func @transform_2(%arg0: i32) -> (i32, i32) {
    %c0_i32 = arith.constant 0 : i32
    %c0_i32_0 = arith.constant 0 : i32
    %c0_i32_1 = arith.constant 0 : i32
    return %c0_i32, %c0_i32_0 : i32, i32
  }
  func.func @transform_3(%arg0: i32) -> (i32, i32) {
    %c0_i32 = arith.constant 0 : i32
    %c0_i32_0 = arith.constant 0 : i32
    return %arg0, %c0_i32 : i32, i32
  }
}

</mosaic_0001>

<bundles_post_ra>
// kernel: tpu_custom_call.1
= control target key start
LH: loop header
LB: loop body
LE: loop exit
PB: predicated region body
PF: predicated region fallthrough
CT: control target
= control target key end

     0   :  { %8 = vsyncpa [#allocation3], 0  ;;  %s438_s0 = inlined_call_operand.hbm [shape: f32[8,64], index: 0, kind: input, shape index: {}]   ;;  %s439_s1 = inlined_call_operand.hbm [shape: f32[8,12], index: 1, kind: input, shape index: {}]   ;;  %s440_s2 = inlined_call_operand.hbm [shape: f32[352,128], index: 2, kind: input, shape index: {}]   ;;  %s441_s3 = inlined_call_operand.hbm [shape: f32[8,16], index: 3, kind: output, shape index: {}]  }
   0x1   :  { %9 = vsyncpa [#allocation6], 0  ;;  %s27_s14 = sshll.u32 %s439_s1, 4  ;;  %s28_s14 = int_to_ptr.hbm [resolvable:$true] %s27_s14 }
   0x2   :  { %10 = vsyncpa [#allocation4], 0  ;;  %s398_s15 = smov [#allocation5]   ;;  %s16_s19 = sshll.u32 %s438_s0, 4  ;;  %s17_s19 = int_to_ptr.hbm [resolvable:$true] %s16_s19 }
   0x3   :  { %s29_s16 = sshll.u32 %s398_s15, 4  ;;  %s399_s20 = smov [#allocation2]   ;;  %s30_s16 = int_to_ptr.vmem [resolvable:$true] %s29_s16 }
   0x4   :  { %32 = dma.hbm_to_vmem [thread:$0]  %s28_s14, 128, %s30_s16, [#allocation6]  }
   0x5   :  { %s18_s21 = sshll.u32 %s399_s20, 4  ;;  %s37_s24 = sshll.u32 %s440_s2, 4  ;;  %s19_s21 = int_to_ptr.vmem [resolvable:$true] %s18_s21  ;;  %s38_s24 = int_to_ptr.hbm [resolvable:$true] %s37_s24 }
   0x6   :  { %21 = dma.hbm_to_vmem [thread:$0]  %s17_s19, 128, %s19_s21, [#allocation3]  }
   0x7   :  { %s400_s1 = smov [#allocation7]   ;;  %s401_s26 = smov 128  }
   0x8   :  { %s39_s25 = sshll.u32 %s400_s1, 4  ;;  %s402_s27 = smov 8   ;;  %s40_s25 = int_to_ptr.vmem [resolvable:$true] %s39_s25 }
   0x9   :  { %45 = dma.hbm_to_vmem [thread:$0]  %s38_s24, 5632, %s40_s25, [#allocation6], %s401_s26, %s401_s26, %s402_s27  }
   0xa   :  { %392 = dma.done.wait [#allocation3], 128  }
   0xb   :  { %393 = vsyncadd [#allocation3], 4294967168 }
   0xc   :  { %394 = dma.done.wait [#allocation6], 5760  }
   0xd   :  { %395 = vsyncadd [#allocation6], 4294961536  ;;  %v67_v0 = vld [vmem:[#allocation7 + $0x38] sm:$0xff]  ;;  %v66_v1 = vld [vmem:[#allocation7 + $0x30] sm:$0xff]  ;;  %vm74_vm0 = vcmask 1043456   ;;  %vm70_vm1 = vcmask 97280  }
   0xe   :  { %110 = vmatpush.msra.mxu1 %v67_v0  ;;  %v65_v2 = vld [vmem:[#allocation7 + $0x28] sm:$0xff]  ;;  %v68_v4 = vld [vmem:[#allocation7 + $0x40] sm:$0xff]  ;;  %v59_v5 = vld [vmem:[#allocation5] sm:$0xff]  ;;  %vm98_vm2 = vcmask 523264   ;;  %vm169_vm3 = vcmask 424960   ;;  %vm203_vm4 = vcmask 261120  }
   0xf   :  { %v69_v3 = vld [vmem:[#allocation7 + $0x48] sm:$0xf]  ;;  %v64_v6 = vld [vmem:[#allocation7 + $0x20] sm:$0xff]  ;;  %v63_v9 = vld [vmem:[#allocation7 + $0x18] sm:$0xff]  ;;  %s403_s0 = smov [#allocation8]   ;;  %s267_s30 = sshll.u32 %s441_s3, 4  ;;  %s268_s30 = int_to_ptr.hbm [resolvable:$true] %s267_s30 }
  0x10   :  { %111 = vmatpush.msra.mxu1 %v66_v1  ;;  %278 = vmatpush.msk.msra.mxu0 %vm74_vm0, %v69_v3  ;;  %v138_v7 = vld [vmem:[#allocation7 + $0xc8] sm:$0xff]  ;;  %v137_v8 = vld [vmem:[#allocation7 + $0xc0] sm:$0xff]  ;;  %v136_v10 = vld [vmem:[#allocation7 + $0xb8] sm:$0xff]  ;;  %s265_s2 = sshll.u32 %s403_s0, 4  ;;  %vm258_vm5 = vcmask 130048   ;;  %s266_s2 = int_to_ptr.vmem [resolvable:$true] %s265_s2 }
  0x11   :  { %139 = vmatpush.msra.mxu2 %v138_v7  ;;  %v62_v11 = vld [vmem:[#allocation7 + $0x10] sm:$0xff]  ;;  %v61_v13 = vld [vmem:[#allocation7 + $0x8] sm:$0xff]  ;;  %v60_v15 = vld [vmem:[#allocation7] sm:$0xff] }
  0x12   :  { %112 = vmatpush.msra.mxu1 %v65_v2  ;;  %93 = vmatpush.msra.mxu0 %v68_v4  ;;  %v135_v12 = vld [vmem:[#allocation7 + $0xb0] sm:$0xff]  ;;  %v134_v14 = vld [vmem:[#allocation7 + $0xa8] sm:$0xff]  ;;  %v133_v17 = vld [vmem:[#allocation7 + $0xa0] sm:$0xff] }
  0x13   :  { %279 = vmatmul.msk.f32.vlgmr.msra.gmra.mxu0 %vm70_vm1, %v59_v5  ;;  %140 = vmatpush.msra.mxu2 %v137_v8  ;;  %v58_v16 = vld [vmem:[#allocation2] sm:$0xff]  ;;  %v132_v18 = vld [vmem:[#allocation7 + $0x98] sm:$0xff]  ;;  %v130_v20 = vld [vmem:[#allocation7 + $0x88] sm:$0xff] }
  0x14   :  { %113 = vmatpush.msra.mxu1 %v64_v6  ;;  %v131_v19 = vld [vmem:[#allocation7 + $0x90] sm:$0xff]  ;;  %v129_v21 = vld [vmem:[#allocation7 + $0x80] sm:$0xff]  ;;  %v128_v22 = vld [vmem:[#allocation7 + $0x78] sm:$0xff] }
  0x15   :  { %141 = vmatpush.msra.mxu2 %v136_v10  ;;  %v127_v23 = vld [vmem:[#allocation7 + $0x70] sm:$0xff]  ;;  %v126_v24 = vld [vmem:[#allocation7 + $0x68] sm:$0xff]  ;;  %v125_v25 = vld [vmem:[#allocation7 + $0x60] sm:$0xff] }
  0x16   :  { %114 = vmatpush.msra.mxu1 %v63_v9  ;;  %v124_v26 = vld [vmem:[#allocation7 + $0x58] sm:$0xff]  ;;  %v123_v27 = vld [vmem:[#allocation7 + $0x50] sm:$0xff]  ;;  %v166_v28 = vld [vmem:[#allocation7 + $0x100] sm:$0xf] }
  0x17   :  { %142 = vmatpush.msra.mxu2 %v135_v12  ;;  %v165_v29 = vld [vmem:[#allocation7 + $0xf8] sm:$0xff]  ;;  %281 = vmatpush.msk.msra.mxu3 %vm74_vm0, %v166_v28  ;;  %v164_v30 = vld [vmem:[#allocation7 + $0xf0] sm:$0xff]  ;;  %v163_v31 = vld [vmem:[#allocation7 + $0xe8] sm:$0xff] }
  0x18   :  { %115 = vmatpush.msra.mxu1 %v62_v11  ;;  %v162_v32 = vld [vmem:[#allocation7 + $0xe0] sm:$0xff]  ;;  %v161_v37 = vld [vmem:[#allocation7 + $0xd8] sm:$0xff]  ;;  %v160_v38 = vld [vmem:[#allocation7 + $0xd0] sm:$0xff] }
  0x19   :  { %143 = vmatpush.msra.mxu2 %v134_v14  ;;  %186 = vmatpush.msra.mxu3 %v165_v29  ;;  %v200_v39 = vld [vmem:[#allocation7 + $0x120] sm:$0xff]  ;;  %v199_v40 = vld [vmem:[#allocation7 + $0x118] sm:$0xff]  ;;  %v198_v43 = vld [vmem:[#allocation7 + $0x110] sm:$0xff] }
  0x1a   :  { %116 = vmatpush.msra.mxu1 %v61_v13  ;;  %219 = vmatpush.msrb.mxu0 %v200_v39  ;;  %v197_v44 = vld [vmem:[#allocation7 + $0x108] sm:$0xff]  ;;  %v231_v45 = vld [vmem:[#allocation7 + $0x140] sm:$0xff]  ;;  %v230_v46 = vld [vmem:[#allocation7 + $0x138] sm:$0xff] }
  0x1b   :  { %144 = vmatpush.msra.mxu2 %v133_v17  ;;  %187 = vmatpush.msra.mxu3 %v164_v30  ;;  %v291_v47 = vld [vmem:[#allocation7 + $0x148] ss:$0 sm:$0xff]  ;;  %v229_v51 = vld [vmem:[#allocation7 + $0x130] sm:$0xff]  ;;  %v293_v57 = vld [vmem:[#allocation7 + $0x158] ss:$0 sm:$0xff] }
  0x1c   :  { %117 = vmatpush.msra.mxu1 %v60_v15  ;;  %220 = vmatpush.msrb.mxu0 %v199_v40  ;;  %v228_v52 = vld [vmem:[#allocation7 + $0x128] sm:$0xff]  ;;  %v292_v53 = vld [vmem:[#allocation7 + $0x150] ss:$0 sm:$0xff] }
  0x1d   :  { %280 = vmatmul.msk.f32.vlgmr.msra.gmra.mxu1 %vm98_vm2, %v58_v16  ;;  %145 = vmatpush.msra.mxu2 %v132_v18 }
  0x1e   :  { %188 = vmatpush.msra.mxu3 %v163_v31  ;;  %221 = vmatpush.msrb.mxu0 %v198_v43 }
  0x1f   :  { %146 = vmatpush.msra.mxu2 %v131_v19 }
  0x20   :  { %189 = vmatpush.msra.mxu3 %v162_v32  ;;  %222 = vmatpush.msrb.mxu0 %v197_v44 }
  0x21   :  { %147 = vmatpush.msra.mxu2 %v130_v20 }
  0x22   :  { %190 = vmatpush.msra.mxu3 %v161_v37  ;;  %249 = vmatpush.msra.mxu0 %v231_v45 }
  0x23   :  { %148 = vmatpush.msra.mxu2 %v129_v21 }
  0x24   :  { %191 = vmatpush.msra.mxu3 %v160_v38  ;;  %250 = vmatpush.msra.mxu0 %v230_v46 }
  0x25   :  { %149 = vmatpush.msra.mxu2 %v128_v22 }
  0x26   :  { %251 = vmatpush.msra.mxu0 %v229_v51 }
  0x27   :  { %150 = vmatpush.msra.mxu2 %v127_v23 }
  0x28   :  { %252 = vmatpush.msra.mxu0 %v228_v52 }
  0x29   :  { %151 = vmatpush.msra.mxu2 %v126_v24 }
  0x2b   :  { %152 = vmatpush.msra.mxu2 %v125_v25 }
  0x2d   :  { %153 = vmatpush.msra.mxu2 %v124_v26 }
  0x2f   :  { %154 = vmatpush.msra.mxu2 %v123_v27 }
  0x90   :  { %v95_v33 = vpop.f32.mrf.mxu0 }
  0x9a   :  { %v119_v34 = vpop.f32.mrf.mxu1 }
  0x9b   :  { %v120_v35 = vadd.f32 %v119_v34, %v95_v33 }
  0x9d   :  { %v122_v36 = vmax.f32 %v120_v35, 0.0 }
  0x9f   :  { %155 = vmatmul.f32.vlgmr.msra.gmra.mxu2 %v122_v36 }
 0x122   :  { %v156_v41 = vpop.f32.mrf.mxu2 }
 0x123   :  { %v159_v42 = vmax.f32 %v156_v41, 0.0 }
 0x125   :  { %282 = vmatmul.msk.f32.vlgmr.msra.gmra.mxu3 %vm169_vm3, %v159_v42 }
 0x1a8   :  { %v193_v48 = vpop.f32.mrf.mxu3 }
 0x1a9   :  { %v194_v49 = vadd.f32 %v291_v47, %v193_v48 }
 0x1ab   :  { %v196_v50 = vmax.f32 %v194_v49, 0.0 }
 0x1ad   :  { %283 = vmatmul.msk.f32.vlgmr.msrb.gmra.mxu0 %vm203_vm4, %v196_v50 }
 0x22a   :  { %v224_v54 = vpop.f32.mrf.mxu0 }
 0x22b   :  { %v225_v55 = vadd.f32 %v292_v53, %v224_v54 }
 0x22d   :  { %v227_v56 = vmax.f32 %v225_v55, 0.0 }
 0x22f   :  { %284 = vmatmul.msk.f32.vlgmr.msra.gmra.mxu0 %vm203_vm4, %v227_v56 }
 0x2ac   :  { %v254_v58 = vpop.f32.mrf.mxu0 }
 0x2ad   :  { %v255_v59 = vadd.f32 %v293_v57, %v254_v58 }
 0x2af   :  { %294 = vtanh.f32 %v255_v59 }
 0x2b5   :  { %v295_v60 = vpop.eup %294 }
 0x2b6   :  { %259 = vst.msk [vmem:[#allocation8] sm:$0xff] %vm258_vm5, %v295_v60 }
 0x2b7   :  { %270 = dma.vmem_to_hbm [thread:$0]  %s266_s2, 128, %s268_s30, [#allocation4]  }
 0x2b8   :  { %396 = dma.done.wait [#allocation4], 128  }
 0x2b9   :  { %397 = vsyncadd [#allocation4], 4294967168 }
 0x2ba   :  { %275 = vsyncpa [#allocation3], 1 }
 0x2bb   :  { %276 = vsyncpa [#allocation6], 1 }
 0x2bc   :  { %277 = vsyncpa [#allocation4], 1 }

</bundles_post_ra>
